<compile_context>
chip_gen: v7x
topology: tpu7x:2x2x1
jax: 0.10.0
libtpu: 0.0.40
codegen_flags: <defaults>
</compile_context>

<pallas_src>
import functools
import math

import jax
import jax.numpy as jnp
from jax.experimental import pallas as pl
from jax.experimental.pallas import tpu as pltpu


# ----------------------------------------------------------------------------
# Geometric attention masks.
# TODO(synk): sin_mask / cos_mask / noise_one / noise_two constructors are not
# in the provided source; only the geometric patterns are implemented.
_GEOMETRIC_MASKS = (
    "diag1", "diag_1", "cross", "bottom", "top",
    "bottom_inv", "top_inv", "left", "right", "zero",
)


def _mask_from_ij(i, j, L, mask_type):
    if mask_type == "diag1":
        m = i == j
    elif mask_type == "diag_1":
        m = i + j == L - 1
    elif mask_type == "cross":
        m = (i == j) | (i + j == L - 1)
    elif mask_type == "bottom":
        m = i >= j
    elif mask_type == "top":
        m = i <= j
    elif mask_type == "bottom_inv":
        m = i < j
    elif mask_type == "top_inv":
        m = i > j
    elif mask_type == "left":
        m = j < L // 2
    elif mask_type == "right":
        m = j >= L // 2
    elif mask_type == "zero":
        m = jnp.zeros_like(i, dtype=bool)
    else:
        raise NotImplementedError(f"mask_type {mask_type!r} not implemented")
    return m.astype(jnp.float32)


# ----------------------------------------------------------------------------
# Kernel 1: batch-invariant attention prep (runs once, gridless).
def _attention_prep_kernel(scale_ref,   # SMEM (1,)    self.scale
                           mw_ref,      # VMEM (1, L)  self.mask_weights
                           att_ref,     # VMEM (L, L)  exact softmax attention
                           att_s_ref,   # VMEM (L, L)  scale * attention
                           *, mask_type, L):
    # Geometric mask generated in-kernel (trivial VPU iota compares; no HBM read).
    i = jax.lax.broadcasted_iota(jnp.int32, (L, L), 0)
    j = jax.lax.broadcasted_iota(jnp.int32, (L, L), 1)
    amask = _mask_from_ij(i, j, L, mask_type)

    # attention_mask.mul(mask_weights): (L, L) * (L,) broadcasts on the key axis.
    # Note: mul-based masking (zeros, not -inf); all-zero rows softmax to 1/L,
    # matching torch's semantics here.
    logits = amask * mw_ref[...]
    m = jnp.max(logits, axis=-1, keepdims=True)
    e = jnp.exp(logits - m)
    att = e / jnp.sum(e, axis=-1, keepdims=True)          # exact (runs once)
    att_ref[...] = att
    att_s_ref[...] = scale_ref[0] * att                   # fold scale into (L,L)


# ----------------------------------------------------------------------------
# Kernel 2: per-batch projection + attention mix (gridded over B, "parallel").
def _fixed_attention_kernel(att_s_ref,   # VMEM (L, L)     scale*att, resident
                            value_ref,   # VMEM (L, Din)   this batch's rows
                            wv_ref,      # VMEM (Din, Dkp) v.weight^T (bf16, padded)
                            bv_ref,      # VMEM (1, Dkp)   v.bias (padded)
                            out_ref):    # VMEM (L, Dkp)   lane-dense output tile
    # value = self.v(value): bf16 operands, f32 accumulation on the MXU.
    vproj = jnp.dot(value_ref[...].astype(jnp.bfloat16), wv_ref[...],
                    preferred_element_type=jnp.float32) + bv_ref[...]
    # out = (scale * att) @ vproj: plain 2D dot, f32 (att kept exact).
    out_ref[...] = jnp.dot(att_s_ref[...], vproj,
                           preferred_element_type=jnp.float32).astype(out_ref.dtype)


# ----------------------------------------------------------------------------
def init_params(key, dim_in, dim_k, L):
    k_w, k_b = jax.random.split(key)
    bound = 1.0 / math.sqrt(dim_in)
    return {
        # nn.Linear(dim_in, dim_k): weight stored transposed as (in, out)
        "wv": jax.random.uniform(k_w, (dim_in, dim_k), jnp.float32, -bound, bound),
        "bv": jax.random.uniform(k_b, (1, dim_k), jnp.float32, -bound, bound),
        "mask_weights": jnp.ones((1, L), jnp.float32),   # torch init: ones(l)
        "scale": jnp.ones((1,), jnp.float32),            # torch init: tensor(1.0)
    }


def fixed_attention_forward(query, key, value, params, mask_type,
                            mask=None, return_att=True):
    # `query` / `key` are ignored by FixedAttention (only `value` is projected).
    del query, key
    if mask is not None:
        raise NotImplementedError(
            "TODO(synk): padding-mask (masked_fill -inf) path not implemented")

    B, L, Din = value.shape
    Dk = params["wv"].shape[1]
    # Pad Dk to a 128-lane multiple so output stores are unmasked (lane-dense).
    Dkp = max(128, ((Dk + 127) // 128) * 128)
    wv_p = jnp.pad(params["wv"], ((0, 0), (0, Dkp - Dk))).astype(jnp.bfloat16)
    bv_p = jnp.pad(params["bv"], ((0, 0), (0, Dkp - Dk)))

    # --- 1) batch-invariant mask + softmax, computed once ---------------------
    att, att_scaled = pl.pallas_call(
        functools.partial(_attention_prep_kernel, mask_type=mask_type, L=L),
        out_shape=[
            jax.ShapeDtypeStruct((L, L), jnp.float32),
            jax.ShapeDtypeStruct((L, L), jnp.float32),
        ],
        in_specs=[
            pl.BlockSpec(memory_space=pltpu.MemorySpace.SMEM),   # scale (1,)
            pl.BlockSpec(memory_space=pltpu.MemorySpace.VMEM),   # mask_weights
        ],
        out_specs=[
            pl.BlockSpec(memory_space=pltpu.MemorySpace.VMEM),
            pl.BlockSpec(memory_space=pltpu.MemorySpace.VMEM),
        ],
    )(params["scale"], params["mask_weights"])

    # --- 2) per-batch projection + mix; grid over B ("parallel") --------------
    value2d = value.reshape(B * L, Din)       # wrapper-side flatten (free)
    out2d = pl.pallas_call(
        _fixed_attention_kernel,
        out_shape=jax.ShapeDtypeStruct((B * L, Dkp), jnp.float32),
        grid=(B,),
        in_specs=[
            pl.BlockSpec((L, L), lambda b: (0, 0)),       # att_scaled, resident
            pl.BlockSpec((L, Din), lambda b: (b, 0)),     # this batch's value rows
            pl.BlockSpec((Din, Dkp), lambda b: (0, 0)),   # weight, resident
            pl.BlockSpec((1, Dkp), lambda b: (0, 0)),     # bias, resident
        ],
        out_specs=pl.BlockSpec((L, Dkp), lambda b: (b, 0)),
        compiler_params=pltpu.CompilerParams(
            dimension_semantics=("parallel",),            # both TCs on v7x
            vmem_limit_bytes=32 * 1024 * 1024,            # safe on v5e/v6e/v7x
        ),
    )(att_scaled, value2d, wv_p, bv_p)

    out = out2d.reshape(B, L, Dkp)[..., :Dk]              # wrapper-side unpad

    if return_att:
        # torch's attention.expand(B, L, L): replicate the single (L, L) tile.
        return out, jnp.broadcast_to(att[None], (B, L, L))
    return out


# ----------------------------------------------------------------------------
def _reference(value, params, mask_type):
    # Pure-JAX reference of the torch forward (f32 everywhere).
    B, L, _ = value.shape
    i = jnp.arange(L)[:, None]
    j = jnp.arange(L)[None, :]
    amask = _mask_from_ij(i, j, L, mask_type)
    vproj = value @ params["wv"] + params["bv"]
    att = jax.nn.softmax(amask * params["mask_weights"], axis=-1)
    out = params["scale"][0] * jnp.einsum('qk,bkd->bqd', att, vproj)
    return out, jnp.broadcast_to(att[None], (B, L, L))


if __name__ == "__main__":
    key = jax.random.PRNGKey(0)
    B, L, Din, Dk = 2, 8, 32, 32
    mask_type = "bottom"

    k_params, k_q, k_k, k_v = jax.random.split(key, 4)
    params = init_params(k_params, Din, Dk, L)
    query = jax.random.normal(k_q, (B, L, Din), jnp.float32)
    key_t = jax.random.normal(k_k, (B, L, Din), jnp.float32)
    value = jax.random.normal(k_v, (B, L, Din), jnp.float32)

    out, att = fixed_attention_forward(query, key_t, value, params, mask_type)
    jax.block_until_ready((out, att))

    assert out.shape == (B, L, Dk)
    assert att.shape == (B, L, L)

    ref_out, ref_att = _reference(value, params, mask_type)
    # Attention is exact f32 softmax (computed once) -> tight tolerance.
    assert jnp.allclose(att, ref_att, atol=1e-5, rtol=1e-5)
    # Output uses bf16 MXU operands for the value projection -> moderate tol.
    assert jnp.allclose(out, ref_out, atol=3e-2, rtol=3e-2)

    print("KERNEL_OK")
</pallas_src>

<mosaic_0001>
module attributes {stable_mosaic.version = 11 : i64} {
  func.func @_attention_prep_kernel(%arg0: memref<1xf32, #tpu.memory_space<smem>>, %arg1: memref<1x8xf32, #tpu.memory_space<vmem>>, %arg2: memref<8x8xf32, #tpu.memory_space<vmem>>, %arg3: memref<8x8xf32, #tpu.memory_space<vmem>>) attributes {dimension_semantics = [], scalar_prefetch = 0 : i64, scratch_operands = 0 : i64, tpu.core_type = #tpu.core_type<tc>} {
    %0 = tpu.iota {dimensions = array<i32: 0>} : vector<8x8xi32>
    %1 = tpu.iota {dimensions = array<i32: 1>} : vector<8x8xi32>
    %2 = arith.cmpi sge, %0, %1 : vector<8x8xi32>
    %3 = arith.extui %2 : vector<8x8xi1> to vector<8x8xi32>
    %4 = arith.sitofp %3 : vector<8x8xi32> to vector<8x8xf32>
    %c0 = arith.constant 0 : index
    %c0_0 = arith.constant 0 : index
    %5 = vector.load %arg1[%c0, %c0_0] : memref<1x8xf32, #tpu.memory_space<vmem>>, vector<1x8xf32>
    %6 = vector.broadcast %5 : vector<1x8xf32> to vector<8x8xf32>
    %7 = arith.mulf %4, %6 : vector<8x8xf32>
    %cst = arith.constant dense<0xFF800000> : vector<8xf32>
    %8 = vector.multi_reduction <maximumf>, %7, %cst [1] : vector<8x8xf32> to vector<8xf32>
    %9 = vector.shape_cast %8 : vector<8xf32> to vector<8x1xf32>
    %10 = vector.broadcast %9 : vector<8x1xf32> to vector<8x8xf32>
    %11 = arith.subf %7, %10 : vector<8x8xf32>
    %12 = math.exp %11 : vector<8x8xf32>
    %cst_1 = arith.constant dense<0.000000e+00> : vector<8xf32>
    %13 = vector.multi_reduction <add>, %12, %cst_1 [1] : vector<8x8xf32> to vector<8xf32>
    %14 = vector.shape_cast %13 : vector<8xf32> to vector<8x1xf32>
    %15 = vector.broadcast %14 : vector<8x1xf32> to vector<8x8xf32>
    %16 = arith.divf %12, %15 : vector<8x8xf32>
    %c0_2 = arith.constant 0 : index
    %c0_3 = arith.constant 0 : index
    %17 = vector.load %arg2[%c0_2, %c0_3] : memref<8x8xf32, #tpu.memory_space<vmem>>, vector<8x8xf32>
    tpu.vector_store %arg2[%c0_2, %c0_3], %16 {strides = array<i32>} : memref<8x8xf32, #tpu.memory_space<vmem>>, vector<8x8xf32>,
    %c0_4 = arith.constant 0 : index
    %18 = memref.load %arg0[%c0_4] : memref<1xf32, #tpu.memory_space<smem>>
    %19 = vector.broadcast %18 : f32 to vector<8x8xf32>
    %20 = arith.mulf %19, %16 : vector<8x8xf32>
    %c0_5 = arith.constant 0 : index
    %c0_6 = arith.constant 0 : index
    %21 = vector.load %arg3[%c0_5, %c0_6] : memref<8x8xf32, #tpu.memory_space<vmem>>, vector<8x8xf32>
    tpu.vector_store %arg3[%c0_5, %c0_6], %20 {strides = array<i32>} : memref<8x8xf32, #tpu.memory_space<vmem>>, vector<8x8xf32>,
    return
  }
}

</mosaic_0001>

<bundles_post_ra>
// kernel: tpu_custom_call.1
= control target key start
LH: loop header
LB: loop body
LE: loop exit
PB: predicated region body
PF: predicated region fallthrough
CT: control target
= control target key end

     0   :  { %10 = vsyncpa [#allocation4], 0  ;;  %v16_v0 = vlaneseq  ;;  %s190_s0 = inlined_call_operand.<no memory space> [shape: f32[1], index: 0, kind: input, shape index: {}]   ;;  %s191_s1 = inlined_call_operand.vmem [shape: f32[1,8], index: 1, kind: input, shape index: {}]   ;;  %s192_s2 = inlined_call_operand.hbm [shape: f32[8,8], index: 2, kind: output, shape index: {0}]   ;;  %s193_s3 = inlined_call_operand.hbm [shape: f32[8,8], index: 3, kind: output, shape index: {1}]  }
   0x1   :  { %11 = vsyncpa [#allocation6], 0  ;;  %v77_v3 = vld [vmem:[%s191_s1] ss:$0 sm:$0xff]  ;;  %v133_v4 = vmov 0.0   ;;  %vm31_vm1 = vcmask 64512   ;;  %v45_v15 = vstv %s190_s0 }
   0x2   :  { %v17_v1 = vshrl.u32 %v16_v0, 7  ;;  %v19_v2 = vand.u32 127, %v16_v0  ;;  %s134_s14 = smov [#allocation3]   ;;  %s135_s17 = smov [#allocation5]  }
   0x3   :  { %s54_s1 = sshll.u32 %s134_s14, 4  ;;  %s64_s18 = sshll.u32 %s135_s17, 4  ;;  %s55_s1 = int_to_ptr.vmem [resolvable:$true] %s54_s1  ;;  %s65_s18 = int_to_ptr.vmem [resolvable:$true] %s64_s18 }
   0x4   :  { %vm20_vm0 = vcmp.ge.s32.totalorder %v17_v1, %v19_v2  ;;  %s85_s19 = scalar_lea.vmem %s55_s1, 128  ;;  %p90_p1 = scmp.lt.s32.totalorder %s55_s1, %s55_s1 }
   0x5   :  { %v76_v5 = vsel %vm20_vm0, 1.0, %v133_v4  ;;  %p86_p0 = scmp.ne.s32.totalorder %s55_s1, %s85_s19  ;;  %p91_p2 = scmp.lt.s32.totalorder %s85_s19, %s85_s19 }
   0x6   :  { %v30_v6 = vmul.f32 %v77_v3, %v76_v5 }
   0x7   :  { %p92_p3 = por %p91_p2, %p90_p1 }
   0x8   :  { %v32_v7 = vsel %vm31_vm1, %v30_v6, -inf }
   0x9   :  { %33 = vmax.xlane.f32.xlu0 %v32_v7  ;;  %p93_p4 = pnand %p92_p3, %p86_p0 }
  0x96   :  { %v34_v8 = vpop.xlane.xlu0 %33 }
  0x97   :  { %v35_v9 = vsub.f32 %v30_v6, %v34_v8 }
  0x99   :  { %v36_v10 = vmul.f32 1.442695, %v35_v9 }
  0x9b   :  { %81 = vpow2.f32 %v36_v10 }
  0xa5   :  { %v82_v11 = vpop.eup %81 }
  0xa6   :  { %v38_v12 = vsel %vm31_vm1, %v82_v11, 0.0 }
  0xa7   :  { %39 = vadd.xlane.f32.xlu0 %v38_v12 }
 0x134   :  { %v40_v13 = vpop.xlane.xlu0 %39 }
 0x135   :  { %83 = vrcp.f32 %v40_v13 }
 0x13f   :  { %v84_v14 = vpop.eup %83 }
 0x140   :  { %v42_v16 = vmul.f32 %v84_v14, %v82_v11 }
 0x142   :  { %43 = vst.msk [vmem:[#allocation3] sm:$0xff] %vm31_vm1, %v42_v16  ;;  %v46_v17 = vmul.f32 %v45_v15, %v42_v16 }
 0x143   :  { %96 = shalt.err (!%p93_p4)
}
 0x144   :  { %s97_s22 = scalar_lea.hbm %s192_s2, 128 }
 0x145   :  { %p98_p5 = scmp.ne.s32.totalorder %s192_s2, %s97_s22  ;;  %p101_p6 = scmp.lt.u32.totalorder %s97_s22, %s192_s2 }
 0x147   :  { %p103_p7 = pnand %p101_p6, %p98_p5 }
 0x149   :  { %106 = shalt.err (!%p103_p7)
}
 0x14a   :  { %57 = dma.vmem_to_hbm [thread:$0]  %s55_s1, 128, %s192_s2, [#allocation4]   ;;  %47 = vst.msk [vmem:[#allocation5] sm:$0xff] %vm31_vm1, %v46_v17 }
 0x14b   :  { %s107_s28 = scalar_lea.vmem %s65_s18, 128  ;;  %p112_p9 = scmp.lt.s32.totalorder %s65_s18, %s65_s18 }
 0x14c   :  { %p108_p8 = scmp.ne.s32.totalorder %s65_s18, %s107_s28  ;;  %p113_p10 = scmp.lt.s32.totalorder %s107_s28, %s107_s28 }
 0x14e   :  { %p114_p11 = por %p113_p10, %p112_p9 }
 0x150   :  { %p115_p12 = pnand %p114_p11, %p108_p8 }
 0x152   :  { %118 = shalt.err (!%p115_p12)
}
 0x153   :  { %s119_s4 = scalar_lea.hbm %s193_s3, 128 }
 0x154   :  { %p120_p13 = scmp.ne.s32.totalorder %s193_s3, %s119_s4  ;;  %p123_p0 = scmp.lt.u32.totalorder %s119_s4, %s193_s3 }
 0x156   :  { %p125_p1 = pnand %p123_p0, %p120_p13 }
 0x158   :  { %128 = shalt.err (!%p125_p1)
}
 0x159   :  { %67 = dma.vmem_to_hbm [thread:$0]  %s65_s18, 128, %s193_s3, [#allocation6]  }
 0x15a   :  { %129 = dma.done.wait [#allocation4], 128  }
 0x15b   :  { %130 = vsyncadd [#allocation4], 4294967168 }
 0x15c   :  { %131 = dma.done.wait [#allocation6], 128  }
 0x15d   :  { %132 = vsyncadd [#allocation6], 4294967168 }
 0x15e   :  { %74 = vsyncpa [#allocation4], 1 }
 0x15f   :  { %75 = vsyncpa [#allocation6], 1 }

</bundles_post_ra>
